<compile_context>
chip_gen: v6e
topology: v6e:2x2x1
jax: 0.10.0
libtpu: 0.0.40
codegen_flags: <defaults>
</compile_context>

<pallas_src>
import functools
import math

import numpy as np
import jax
import jax.numpy as jnp
from jax.experimental import pallas as pl
from jax.experimental.pallas import tpu as pltpu

EPS = 1e-5
K = 4        # transposed-conv kernel size of every "Same" block
STRIDE = 2   # transposed-conv stride of every "Same" block
_VMEM = pltpu.MemorySpace.VMEM


# ----------------------------- Pallas kernels ------------------------------ #

def _mm_bn_relu_kernel(x_ref, w_ref, gb_ref, o_ref, *, n_groups, group_size):
    """Fused matmul + BatchNorm2d (training-mode batch stats) + ReLU.

    x_ref : (M, Kdim)     f32    activations / 3x3 patches
    w_ref : (Kdim, G*C)   f32    packed weights, columns grouped (group, channel)
    gb_ref: (2, G*C)      f32    row0 = gamma tiled over groups, row1 = beta tiled
    o_ref : (M, G*C)      f32

    Each channel appears in `n_groups` column groups (output spatial parities for
    the conv blocks, kernel spatial taps for the projection), so BN statistics are
    reduced over the row axis and folded across the groups with static lane slices.
    """
    y = jnp.dot(x_ref[...], w_ref[...], preferred_element_type=jnp.float32)
    count = y.shape[0] * n_groups        # = B * OH * OW elements per channel

    def fold(v):                          # (1, G*C) -> (1, C): sum across groups
        acc = v[:, 0:group_size]
        for g in range(1, n_groups):
            acc = acc + v[:, g * group_size:(g + 1) * group_size]
        return acc

    mean_c = fold(jnp.sum(y, axis=0, keepdims=True)) / count
    mean = jnp.concatenate([mean_c] * n_groups, axis=1)
    d = y - mean
    var_c = fold(jnp.sum(d * d, axis=0, keepdims=True)) / count     # biased variance
    inv = jax.lax.rsqrt(jnp.concatenate([var_c] * n_groups, axis=1) + EPS)
    o_ref[...] = jnp.maximum(d * inv * gb_ref[0:1, :] + gb_ref[1:2, :], 0.0)


def _mm_bias_tanh_t_kernel(w_ref, x_ref, bias_ref, o_ref):
    """Output block, transposed orientation so the output lane dim is B*H*W.

    w_ref   : (4*Cout, 9*Cin) f32
    x_ref   : (9*Cin, M)      f32
    bias_ref: (4*Cout, 1)     f32
    o_ref   : (4*Cout, M)     f32
    """
    y = jnp.dot(w_ref[...], x_ref[...], preferred_element_type=jnp.float32)
    o_ref[...] = jnp.tanh(y + bias_ref[...])


def _call(kernel, out_shape, *inputs):
    # Operands are tiny (<1 MB): single invocation, no grid, everything in VMEM.
    # TODO(synk): for much larger batch / image sizes add a 'parallel' grid axis over
    # the row dimension (megacore) and tile the matmul / re-budget VMEM at 64 MiB.
    return pl.pallas_call(
        kernel,
        out_shape=out_shape,
        in_specs=[pl.BlockSpec(memory_space=_VMEM) for _ in inputs],
        out_specs=pl.BlockSpec(memory_space=_VMEM),
    )(*inputs)


def mm_bn_relu(x, w, gb, *, n_groups, group_size):
    kern = functools.partial(_mm_bn_relu_kernel,
                             n_groups=n_groups, group_size=group_size)
    return _call(kern, jax.ShapeDtypeStruct((x.shape[0], w.shape[1]), jnp.float32),
                 x, w, gb)


def mm_bias_tanh_t(w_t, x_t, bias_t):
    return _call(_mm_bias_tanh_t_kernel,
                 jax.ShapeDtypeStruct((w_t.shape[0], x_t.shape[1]), jnp.float32),
                 w_t, x_t, bias_t)


# ------------------------- Generator configuration ------------------------- #

def conv_out_size_same(size, stride):
    return int(math.ceil(float(size) / float(stride)))


def compute_padding_same(in_size, out_size, kernel, stride):
    res = (in_size - 1) * stride - out_size + kernel
    out_padding = 0 if res % 2 == 0 else 1
    padding = (res + out_padding) // 2
    return int(padding), int(out_padding)


def make_generator_config(image_size, z_dim, n_blocks, filter_dim):
    n_channels, cur_h, cur_w = image_size
    blocks_rev = []
    for i in range(n_blocks):
        sh = conv_out_size_same(cur_h, 2)
        sw = conv_out_size_same(cur_w, 2)
        pad_h, opad_h = compute_padding_same(sh, cur_h, K, STRIDE)
        pad_w, opad_w = compute_padding_same(sw, cur_w, K, STRIDE)
        # TODO(synk): odd spatial sizes need output_padding=1 (asymmetric pad); not
        # needed for the power-of-two image sizes used here.
        assert opad_h == 0 and opad_w == 0 and pad_h == 1 and pad_w == 1
        if i == 0:
            blk = dict(cin=filter_dim, cout=n_channels, bn=False)
        else:
            blk = dict(cin=filter_dim * 2 ** i, cout=filter_dim * 2 ** (i - 1), bn=True)
        blk.update(in_hw=(sh, sw), out_hw=(cur_h, cur_w), pad=(pad_h, pad_w))
        blocks_rev.append(blk)
        cur_h, cur_w = sh, sw
    c0 = filter_dim * 2 ** (n_blocks - 1)
    return dict(z_dim=z_dim, c0=c0, proj_hw=(cur_h, cur_w),
                n_channels=n_channels, blocks=list(reversed(blocks_rev)))


def init_params(cfg, key):
    # weights_init semantics: conv weights ~ N(0, 0.02), conv bias = 0,
    # BatchNorm weight ~ N(1, 0.02), BatchNorm bias = 0.
    keys = list(jax.random.split(key, 2 + 2 * len(cfg["blocks"])))
    ki = iter(keys)
    z_dim, c0 = cfg["z_dim"], cfg["c0"]
    ph, pw = cfg["proj_hw"]
    params = {
        "proj_w": 0.02 * jax.random.normal(next(ki), (z_dim, c0, ph, pw), jnp.float32),
        "proj_bn_g": 1.0 + 0.02 * jax.random.normal(next(ki), (c0,), jnp.float32),
        "proj_bn_b": jnp.zeros((c0,), jnp.float32),
        "blocks": [],
    }
    for blk in cfg["blocks"]:
        p = {"w": 0.02 * jax.random.normal(
            next(ki), (blk["cin"], blk["cout"], K, K), jnp.float32)}
        if blk["bn"]:
            p["bn_g"] = 1.0 + 0.02 * jax.random.normal(next(ki), (blk["cout"],), jnp.float32)
            p["bn_b"] = jnp.zeros((blk["cout"],), jnp.float32)
        else:
            _ = next(ki)
            p["bias"] = jnp.zeros((blk["cout"],), jnp.float32)
        params["blocks"].append(p)
    return params


# ------------------------- one-time parameter packing ----------------------- #

def _pack_convT_weight(w, pad_hw):
    """PyTorch ConvTranspose2d weight (Cin, Cout, 4, 4), stride 2, pad 1 ->
    (9*Cin, 4*Cout) matrix: for each input pixel, its 3x3 neighbourhood
    (rows ordered (dh, dw, ci)) produces the 2x2 block of output pixels it owns
    (columns ordered (ph, pw, co)); output pixel = (2*ih + ph, 2*iw + pw)."""
    assert pad_hw == (1, 1)
    cin, cout, kk, _ = w.shape
    assert kk == K
    wm = np.zeros((9 * cin, 4 * cout), np.float32)
    for ph in range(2):
        for pw in range(2):
            for dh in (-1, 0, 1):
                kh = ph + 1 - 2 * dh            # from oh = 2*ih - 1 + kh, ih = oi + dh
                if not 0 <= kh < K:
                    continue
                for dw in (-1, 0, 1):
                    kw = pw + 1 - 2 * dw
                    if not 0 <= kw < K:
                        continue
                    r0 = ((dh + 1) * 3 + (dw + 1)) * cin
                    col0 = (ph * 2 + pw) * cout
                    wm[r0:r0 + cin, col0:col0 + cout] = w[:, :, kh, kw]
    return wm


def pack_params(params, cfg):
    """One-time (offline) packing into the exact layouts the kernels consume:
    f32 matmul operands, gamma/beta/bias pre-tiled over the parity groups."""
    z_dim, c0 = cfg["z_dim"], cfg["c0"]
    ph, pw = cfg["proj_hw"]
    ng = ph * pw
    wp = np.asarray(params["proj_w"])                       # (z, c0, ph, pw)
    packed = {
        "proj_w": jnp.asarray(np.transpose(wp, (0, 2, 3, 1)).reshape(z_dim, ng * c0),
                              dtype=jnp.float32),
        "proj_gb": jnp.asarray(np.stack([np.tile(np.asarray(params["proj_bn_g"]), ng),
                                         np.tile(np.asarray(params["proj_bn_b"]), ng)]),
                               dtype=jnp.float32),
        "blocks": [],
    }
    for blk, p in zip(cfg["blocks"], params["blocks"]):
        wm = _pack_convT_weight(np.asarray(p["w"]), blk["pad"])
        if blk["bn"]:
            entry = {
                "w": jnp.asarray(wm, jnp.float32),
                "gb": jnp.asarray(np.stack([np.tile(np.asarray(p["bn_g"]), 4),
                                            np.tile(np.asarray(p["bn_b"]), 4)]),
                                  dtype=jnp.float32),
            }
        else:
            entry = {
                "w_t": jnp.asarray(wm.T, jnp.float32),                   # (4*Cout, 9*Cin)
                "bias_t": jnp.asarray(np.tile(np.asarray(p["bias"]), 4)[:, None],
                                      dtype=jnp.float32),                # (4*Cout, 1)
            }
        packed["blocks"].append(entry)
    return packed


# ----------------------- forward pass (JAX glue + kernels) ------------------ #

def _extract_3x3(x):
    # x: (B, Sh, Sw, C) -> (B*Sh*Sw, 9*C); tap order (dh, dw), channels innermost.
    b, sh, sw, c = x.shape
    xp = jnp.pad(x, ((0, 0), (1, 1), (1, 1), (0, 0)))
    taps = [xp[:, 1 + dh:1 + dh + sh, 1 + dw:1 + dw + sw, :]
            for dh in (-1, 0, 1) for dw in (-1, 0, 1)]
    return jnp.concatenate(taps, axis=-1).reshape(b * sh * sw, 9 * c)


def _depth_to_space(y_packed, b, sh, sw, cout):
    # (B*Sh*Sw, 4*Cout), columns (ph, pw, co) -> NHWC (B, 2*Sh, 2*Sw, Cout)
    y = y_packed.reshape(b, sh, sw, 2, 2, cout)
    return jnp.transpose(y, (0, 1, 3, 2, 4, 5)).reshape(b, 2 * sh, 2 * sw, cout)


def generator_forward(z, packed, cfg):
    b = z.shape[0]
    c0 = cfg["c0"]
    ph, pw = cfg["proj_hw"]

    # project: ConvTranspose2d(z_dim, c0, (ph, pw), stride=1, pad=0, bias=False) on a
    # 1x1 input == one matmul (columns ordered (i, j, c)); BN + ReLU fused in-kernel.
    y = mm_bn_relu(z.astype(jnp.float32), packed["proj_w"], packed["proj_gb"],
                   n_groups=ph * pw, group_size=c0)             # (B, ph*pw*c0) f32
    x = y.reshape(b, ph, pw, c0)                                # NHWC

    for blk, p in zip(cfg["blocks"], packed["blocks"]):
        sh, sw = blk["in_hw"]
        cols = _extract_3x3(x)                                  # (B*sh*sw, 9*Cin) f32
        if blk["bn"]:
            yp = mm_bn_relu(cols, p["w"], p["gb"], n_groups=4, group_size=blk["cout"])
        else:
            yp = mm_bias_tanh_t(p["w_t"], cols.T, p["bias_t"]).T   # (B*sh*sw, 4*Cout)
        x = _depth_to_space(yp, b, sh, sw, blk["cout"])
    return jnp.transpose(x, (0, 3, 1, 2))                       # NCHW


# --------------------------- pure-numpy reference --------------------------- #

def _np_conv_transpose(x, w, stride, pad_hw, oh, ow, bias=None):
    b, cin, ih, iw = x.shape
    cout, k = w.shape[1], w.shape[2]
    out = np.zeros((b, cout, oh, ow), np.float32)
    for ihh in range(ih):
        for iww in range(iw):
            contrib = x[:, :, ihh, iww]
            for kh in range(k):
                ohh = ihh * stride - pad_hw[0] + kh
                if ohh < 0 or ohh >= oh:
                    continue
                for kw in range(k):
                    oww = iww * stride - pad_hw[1] + kw
                    if oww < 0 or oww >= ow:
                        continue
                    out[:, :, ohh, oww] += contrib @ w[:, :, kh, kw]
    if bias is not None:
        out += bias[None, :, None, None]
    return out


def _np_bn_relu(x, g, b):
    mean = x.mean(axis=(0, 2, 3), keepdims=True)
    var = x.var(axis=(0, 2, 3), keepdims=True)
    xn = (x - mean) / np.sqrt(var + EPS)
    return np.maximum(xn * g[None, :, None, None] + b[None, :, None, None], 0.0)


def reference_forward(z, params, cfg):
    y = np.einsum("bz,zcij->bcij", z, params["proj_w"]).astype(np.float32)
    x = _np_bn_relu(y, params["proj_bn_g"], params["proj_bn_b"])
    for blk, p in zip(cfg["blocks"], params["blocks"]):
        oh, ow = blk["out_hw"]
        if blk["bn"]:
            x = _np_conv_transpose(x, p["w"], STRIDE, blk["pad"], oh, ow)
            x = _np_bn_relu(x, p["bn_g"], p["bn_b"])
        else:
            x = _np_conv_transpose(x, p["w"], STRIDE, blk["pad"], oh, ow, bias=p["bias"])
            x = np.tanh(x)
    return x


# ----------------------------------- main ----------------------------------- #

if __name__ == "__main__":
    image_size = (1, 16, 16)   # (n_channels, H, W)
    z_dim, n_blocks, filter_dim, batch = 32, 3, 8, 2

    cfg = make_generator_config(image_size, z_dim, n_blocks, filter_dim)
    key = jax.random.PRNGKey(0)
    kp, kz = jax.random.split(key)
    params = init_params(cfg, kp)
    packed = pack_params(params, cfg)            # one-time, offline weight packing
    z = jax.random.normal(kz, (batch, z_dim), jnp.float32)

    out = jax.jit(lambda zz: generator_forward(zz, packed, cfg))(z)
    out = jax.block_until_ready(out)
    assert out.shape == (batch,) + image_size, out.shape

    np_params = jax.tree_util.tree_map(np.asarray, params)
    ref = reference_forward(np.asarray(z), np_params, cfg)
    # Tolerance covers MXU pass-rounding / accumulation-order differences vs. the
    # plain numpy f32 reference across 4 stacked layers.
    np.testing.assert_allclose(np.asarray(out), ref, rtol=5e-3, atol=5e-3)

    print("KERNEL_OK")
</pallas_src>

<mosaic_0001>
module attributes {stable_mosaic.version = 11 : i64} {
  func.func @_mm_bn_relu_kernel(%arg0: memref<2x32xf32, #tpu.memory_space<vmem>>, %arg1: memref<32x128xf32, #tpu.memory_space<vmem>>, %arg2: memref<2x128xf32, #tpu.memory_space<vmem>>, %arg3: memref<2x128xf32, #tpu.memory_space<vmem>>) attributes {dimension_semantics = [], scalar_prefetch = 0 : i64, scratch_operands = 0 : i64, tpu.core_type = #tpu.core_type<tc>} {
    %c0 = arith.constant 0 : index
    %c0_0 = arith.constant 0 : index
    %0 = vector.load %arg0[%c0, %c0_0] : memref<2x32xf32, #tpu.memory_space<vmem>>, vector<2x32xf32>
    %c0_1 = arith.constant 0 : index
    %c0_2 = arith.constant 0 : index
    %1 = vector.load %arg1[%c0_1, %c0_2] : memref<32x128xf32, #tpu.memory_space<vmem>>, vector<32x128xf32>
    %cst = arith.constant dense<0.000000e+00> : vector<2x128xf32>
    %2 = tpu.matmul %0, %1, %cst {dimension_numbers = #tpu.dot_dimension_numbers<[1], [0], [0], [1], [0, 0, 1, 1], [], []>} : vector<2x32xf32>, vector<32x128xf32>, vector<2x128xf32> -> vector<2x128xf32>
    %cst_3 = arith.constant dense<0.000000e+00> : vector<128xf32>
    %3 = vector.multi_reduction <add>, %2, %cst_3 [0] : vector<2x128xf32> to vector<128xf32>
    %4 = vector.shape_cast %3 : vector<128xf32> to vector<1x128xf32>
    %5 = vector.extract_strided_slice %4 {offsets = [0, 0], sizes = [1, 32], strides = [1, 1]} : vector<1x128xf32> to vector<1x32xf32>
    %6 = vector.extract_strided_slice %4 {offsets = [0, 32], sizes = [1, 32], strides = [1, 1]} : vector<1x128xf32> to vector<1x32xf32>
    %7 = arith.addf %5, %6 : vector<1x32xf32>
    %8 = vector.extract_strided_slice %4 {offsets = [0, 64], sizes = [1, 32], strides = [1, 1]} : vector<1x128xf32> to vector<1x32xf32>
    %9 = arith.addf %7, %8 : vector<1x32xf32>
    %10 = vector.extract_strided_slice %4 {offsets = [0, 96], sizes = [1, 32], strides = [1, 1]} : vector<1x128xf32> to vector<1x32xf32>
    %11 = arith.addf %9, %10 : vector<1x32xf32>
    %cst_4 = arith.constant 8.000000e+00 : f32
    %12 = vector.broadcast %cst_4 : f32 to vector<1x32xf32>
    %13 = arith.divf %11, %12 : vector<1x32xf32>
    %14 = tpu.concatenate %13, %13, %13, %13 in 1 : vector<1x32xf32>, vector<1x32xf32>, vector<1x32xf32>, vector<1x32xf32> -> vector<1x128xf32>
    %15 = vector.broadcast %14 : vector<1x128xf32> to vector<2x128xf32>
    %16 = arith.subf %2, %15 : vector<2x128xf32>
    %17 = arith.mulf %16, %16 : vector<2x128xf32>
    %cst_5 = arith.constant dense<0.000000e+00> : vector<128xf32>
    %18 = vector.multi_reduction <add>, %17, %cst_5 [0] : vector<2x128xf32> to vector<128xf32>
    %19 = vector.shape_cast %18 : vector<128xf32> to vector<1x128xf32>
    %20 = vector.extract_strided_slice %19 {offsets = [0, 0], sizes = [1, 32], strides = [1, 1]} : vector<1x128xf32> to vector<1x32xf32>
    %21 = vector.extract_strided_slice %19 {offsets = [0, 32], sizes = [1, 32], strides = [1, 1]} : vector<1x128xf32> to vector<1x32xf32>
    %22 = arith.addf %20, %21 : vector<1x32xf32>
    %23 = vector.extract_strided_slice %19 {offsets = [0, 64], sizes = [1, 32], strides = [1, 1]} : vector<1x128xf32> to vector<1x32xf32>
    %24 = arith.addf %22, %23 : vector<1x32xf32>
    %25 = vector.extract_strided_slice %19 {offsets = [0, 96], sizes = [1, 32], strides = [1, 1]} : vector<1x128xf32> to vector<1x32xf32>
    %26 = arith.addf %24, %25 : vector<1x32xf32>
    %cst_6 = arith.constant 8.000000e+00 : f32
    %27 = vector.broadcast %cst_6 : f32 to vector<1x32xf32>
    %28 = arith.divf %26, %27 : vector<1x32xf32>
    %29 = tpu.concatenate %28, %28, %28, %28 in 1 : vector<1x32xf32>, vector<1x32xf32>, vector<1x32xf32>, vector<1x32xf32> -> vector<1x128xf32>
    %cst_7 = arith.constant 9.99999974E-6 : f32
    %30 = vector.broadcast %cst_7 : f32 to vector<1x128xf32>
    %31 = arith.addf %29, %30 : vector<1x128xf32>
    %32 = math.rsqrt %31 : vector<1x128xf32>
    %33 = vector.broadcast %32 : vector<1x128xf32> to vector<2x128xf32>
    %34 = arith.mulf %16, %33 : vector<2x128xf32>
    %c0_8 = arith.constant 0 : index
    %c0_9 = arith.constant 0 : index
    %35 = vector.load %arg2[%c0_8, %c0_9] : memref<2x128xf32, #tpu.memory_space<vmem>>, vector<1x128xf32>
    %36 = vector.broadcast %35 : vector<1x128xf32> to vector<2x128xf32>
    %37 = arith.mulf %34, %36 : vector<2x128xf32>
    %c1 = arith.constant 1 : index
    %c0_10 = arith.constant 0 : index
    %38 = vector.load %arg2[%c1, %c0_10] : memref<2x128xf32, #tpu.memory_space<vmem>>, vector<1x128xf32>
    %39 = vector.broadcast %38 : vector<1x128xf32> to vector<2x128xf32>
    %40 = arith.addf %37, %39 : vector<2x128xf32>
    %cst_11 = arith.constant 0.000000e+00 : f32
    %41 = vector.broadcast %cst_11 : f32 to vector<2x128xf32>
    %42 = arith.maximumf %40, %41 : vector<2x128xf32>
    %c0_12 = arith.constant 0 : index
    %c0_13 = arith.constant 0 : index
    %43 = vector.load %arg3[%c0_12, %c0_13] : memref<2x128xf32, #tpu.memory_space<vmem>>, vector<2x128xf32>
    tpu.vector_store %arg3[%c0_12, %c0_13], %42 {strides = array<i32>} : memref<2x128xf32, #tpu.memory_space<vmem>>, vector<2x128xf32>,
    return
  }
}

module attributes {stable_mosaic.version = 11 : i64} {
  func.func @_mm_bn_relu_kernel(%arg0: memref<8x288xf32, #tpu.memory_space<vmem>>, %arg1: memref<288x64xf32, #tpu.memory_space<vmem>>, %arg2: memref<2x64xf32, #tpu.memory_space<vmem>>, %arg3: memref<8x64xf32, #tpu.memory_space<vmem>>) attributes {dimension_semantics = [], scalar_prefetch = 0 : i64, scratch_operands = 0 : i64, tpu.core_type = #tpu.core_type<tc>} {
    %c0 = arith.constant 0 : index
    %c0_0 = arith.constant 0 : index
    %0 = vector.load %arg0[%c0, %c0_0] : memref<8x288xf32, #tpu.memory_space<vmem>>, vector<8x288xf32>
    %c0_1 = arith.constant 0 : index
    %c0_2 = arith.constant 0 : index
    %1 = vector.load %arg1[%c0_1, %c0_2] : memref<288x64xf32, #tpu.memory_space<vmem>>, vector<288x64xf32>
    %cst = arith.constant dense<0.000000e+00> : vector<8x64xf32>
    %2 = tpu.matmul %0, %1, %cst {dimension_numbers = #tpu.dot_dimension_numbers<[1], [0], [0], [1], [0, 0, 1, 1], [], []>} : vector<8x288xf32>, vector<288x64xf32>, vector<8x64xf32> -> vector<8x64xf32>
    %cst_3 = arith.constant dense<0.000000e+00> : vector<64xf32>
    %3 = vector.multi_reduction <add>, %2, %cst_3 [0] : vector<8x64xf32> to vector<64xf32>
    %4 = vector.shape_cast %3 : vector<64xf32> to vector<1x64xf32>
    %5 = vector.extract_strided_slice %4 {offsets = [0, 0], sizes = [1, 16], strides = [1, 1]} : vector<1x64xf32> to vector<1x16xf32>
    %6 = vector.extract_strided_slice %4 {offsets = [0, 16], sizes = [1, 16], strides = [1, 1]} : vector<1x64xf32> to vector<1x16xf32>
    %7 = arith.addf %5, %6 : vector<1x16xf32>
    %8 = vector.extract_strided_slice %4 {offsets = [0, 32], sizes = [1, 16], strides = [1, 1]} : vector<1x64xf32> to vector<1x16xf32>
    %9 = arith.addf %7, %8 : vector<1x16xf32>
    %10 = vector.extract_strided_slice %4 {offsets = [0, 48], sizes = [1, 16], strides = [1, 1]} : vector<1x64xf32> to vector<1x16xf32>
    %11 = arith.addf %9, %10 : vector<1x16xf32>
    %cst_4 = arith.constant 3.200000e+01 : f32
    %12 = vector.broadcast %cst_4 : f32 to vector<1x16xf32>
    %13 = arith.divf %11, %12 : vector<1x16xf32>
    %14 = tpu.concatenate %13, %13, %13, %13 in 1 : vector<1x16xf32>, vector<1x16xf32>, vector<1x16xf32>, vector<1x16xf32> -> vector<1x64xf32>
    %15 = vector.broadcast %14 : vector<1x64xf32> to vector<8x64xf32>
    %16 = arith.subf %2, %15 : vector<8x64xf32>
    %17 = arith.mulf %16, %16 : vector<8x64xf32>
    %cst_5 = arith.constant dense<0.000000e+00> : vector<64xf32>
    %18 = vector.multi_reduction <add>, %17, %cst_5 [0] : vector<8x64xf32> to vector<64xf32>
    %19 = vector.shape_cast %18 : vector<64xf32> to vector<1x64xf32>
    %20 = vector.extract_strided_slice %19 {offsets = [0, 0], sizes = [1, 16], strides = [1, 1]} : vector<1x64xf32> to vector<1x16xf32>
    %21 = vector.extract_strided_slice %19 {offsets = [0, 16], sizes = [1, 16], strides = [1, 1]} : vector<1x64xf32> to vector<1x16xf32>
    %22 = arith.addf %20, %21 : vector<1x16xf32>
    %23 = vector.extract_strided_slice %19 {offsets = [0, 32], sizes = [1, 16], strides = [1, 1]} : vector<1x64xf32> to vector<1x16xf32>
    %24 = arith.addf %22, %23 : vector<1x16xf32>
    %25 = vector.extract_strided_slice %19 {offsets = [0, 48], sizes = [1, 16], strides = [1, 1]} : vector<1x64xf32> to vector<1x16xf32>
    %26 = arith.addf %24, %25 : vector<1x16xf32>
    %cst_6 = arith.constant 3.200000e+01 : f32
    %27 = vector.broadcast %cst_6 : f32 to vector<1x16xf32>
    %28 = arith.divf %26, %27 : vector<1x16xf32>
    %29 = tpu.concatenate %28, %28, %28, %28 in 1 : vector<1x16xf32>, vector<1x16xf32>, vector<1x16xf32>, vector<1x16xf32> -> vector<1x64xf32>
    %cst_7 = arith.constant 9.99999974E-6 : f32
    %30 = vector.broadcast %cst_7 : f32 to vector<1x64xf32>
    %31 = arith.addf %29, %30 : vector<1x64xf32>
    %32 = math.rsqrt %31 : vector<1x64xf32>
    %33 = vector.broadcast %32 : vector<1x64xf32> to vector<8x64xf32>
    %34 = arith.mulf %16, %33 : vector<8x64xf32>
    %c0_8 = arith.constant 0 : index
    %c0_9 = arith.constant 0 : index
    %35 = vector.load %arg2[%c0_8, %c0_9] : memref<2x64xf32, #tpu.memory_space<vmem>>, vector<1x64xf32>
    %36 = vector.broadcast %35 : vector<1x64xf32> to vector<8x64xf32>
    %37 = arith.mulf %34, %36 : vector<8x64xf32>
    %c1 = arith.constant 1 : index
    %c0_10 = arith.constant 0 : index
    %38 = vector.load %arg2[%c1, %c0_10] : memref<2x64xf32, #tpu.memory_space<vmem>>, vector<1x64xf32>
    %39 = vector.broadcast %38 : vector<1x64xf32> to vector<8x64xf32>
    %40 = arith.addf %37, %39 : vector<8x64xf32>
    %cst_11 = arith.constant 0.000000e+00 : f32
    %41 = vector.broadcast %cst_11 : f32 to vector<8x64xf32>
    %42 = arith.maximumf %40, %41 : vector<8x64xf32>
    %c0_12 = arith.constant 0 : index
    %c0_13 = arith.constant 0 : index
    %43 = vector.load %arg3[%c0_12, %c0_13] : memref<8x64xf32, #tpu.memory_space<vmem>>, vector<8x64xf32>
    tpu.vector_store %arg3[%c0_12, %c0_13], %42 {strides = array<i32>} : memref<8x64xf32, #tpu.memory_space<vmem>>, vector<8x64xf32>,
    return
  }
}

module attributes {stable_mosaic.version = 11 : i64} {
  func.func @_mm_bn_relu_kernel(%arg0: memref<32x144xf32, #tpu.memory_space<vmem>>, %arg1: memref<144x32xf32, #tpu.memory_space<vmem>>, %arg2: memref<2x32xf32, #tpu.memory_space<vmem>>, %arg3: memref<32x32xf32, #tpu.memory_space<vmem>>) attributes {dimension_semantics = [], scalar_prefetch = 0 : i64, scratch_operands = 0 : i64, tpu.core_type = #tpu.core_type<tc>} {
    %c0 = arith.constant 0 : index
    %c0_0 = arith.constant 0 : index
    %0 = vector.load %arg0[%c0, %c0_0] : memref<32x144xf32, #tpu.memory_space<vmem>>, vector<32x144xf32>
    %c0_1 = arith.constant 0 : index
    %c0_2 = arith.constant 0 : index
    %1 = vector.load %arg1[%c0_1, %c0_2] : memref<144x32xf32, #tpu.memory_space<vmem>>, vector<144x32xf32>
    %cst = arith.constant dense<0.000000e+00> : vector<32x32xf32>
    %2 = tpu.matmul %0, %1, %cst {dimension_numbers = #tpu.dot_dimension_numbers<[1], [0], [0], [1], [0, 0, 1, 1], [], []>} : vector<32x144xf32>, vector<144x32xf32>, vector<32x32xf32> -> vector<32x32xf32>
    %cst_3 = arith.constant dense<0.000000e+00> : vector<32xf32>
    %3 = vector.multi_reduction <add>, %2, %cst_3 [0] : vector<32x32xf32> to vector<32xf32>
    %4 = vector.shape_cast %3 : vector<32xf32> to vector<1x32xf32>
    %5 = vector.extract_strided_slice %4 {offsets = [0, 0], sizes = [1, 8], strides = [1, 1]} : vector<1x32xf32> to vector<1x8xf32>
    %6 = vector.extract_strided_slice %4 {offsets = [0, 8], sizes = [1, 8], strides = [1, 1]} : vector<1x32xf32> to vector<1x8xf32>
    %7 = arith.addf %5, %6 : vector<1x8xf32>
    %8 = vector.extract_strided_slice %4 {offsets = [0, 16], sizes = [1, 8], strides = [1, 1]} : vector<1x32xf32> to vector<1x8xf32>
    %9 = arith.addf %7, %8 : vector<1x8xf32>
    %10 = vector.extract_strided_slice %4 {offsets = [0, 24], sizes = [1, 8], strides = [1, 1]} : vector<1x32xf32> to vector<1x8xf32>
    %11 = arith.addf %9, %10 : vector<1x8xf32>
    %cst_4 = arith.constant 1.280000e+02 : f32
    %12 = vector.broadcast %cst_4 : f32 to vector<1x8xf32>
    %13 = arith.divf %11, %12 : vector<1x8xf32>
    %14 = tpu.concatenate %13, %13, %13, %13 in 1 : vector<1x8xf32>, vector<1x8xf32>, vector<1x8xf32>, vector<1x8xf32> -> vector<1x32xf32>
    %15 = vector.broadcast %14 : vector<1x32xf32> to vector<32x32xf32>
    %16 = arith.subf %2, %15 : vector<32x32xf32>
    %17 = arith.mulf %16, %16 : vector<32x32xf32>
    %cst_5 = arith.constant dense<0.000000e+00> : vector<32xf32>
    %18 = vector.multi_reduction <add>, %17, %cst_5 [0] : vector<32x32xf32> to vector<32xf32>
    %19 = vector.shape_cast %18 : vector<32xf32> to vector<1x32xf32>
    %20 = vector.extract_strided_slice %19 {offsets = [0, 0], sizes = [1, 8], strides = [1, 1]} : vector<1x32xf32> to vector<1x8xf32>
    %21 = vector.extract_strided_slice %19 {offsets = [0, 8], sizes = [1, 8], strides = [1, 1]} : vector<1x32xf32> to vector<1x8xf32>
    %22 = arith.addf %20, %21 : vector<1x8xf32>
    %23 = vector.extract_strided_slice %19 {offsets = [0, 16], sizes = [1, 8], strides = [1, 1]} : vector<1x32xf32> to vector<1x8xf32>
    %24 = arith.addf %22, %23 : vector<1x8xf32>
    %25 = vector.extract_strided_slice %19 {offsets = [0, 24], sizes = [1, 8], strides = [1, 1]} : vector<1x32xf32> to vector<1x8xf32>
    %26 = arith.addf %24, %25 : vector<1x8xf32>
    %cst_6 = arith.constant 1.280000e+02 : f32
    %27 = vector.broadcast %cst_6 : f32 to vector<1x8xf32>
    %28 = arith.divf %26, %27 : vector<1x8xf32>
    %29 = tpu.concatenate %28, %28, %28, %28 in 1 : vector<1x8xf32>, vector<1x8xf32>, vector<1x8xf32>, vector<1x8xf32> -> vector<1x32xf32>
    %cst_7 = arith.constant 9.99999974E-6 : f32
    %30 = vector.broadcast %cst_7 : f32 to vector<1x32xf32>
    %31 = arith.addf %29, %30 : vector<1x32xf32>
    %32 = math.rsqrt %31 : vector<1x32xf32>
    %33 = vector.broadcast %32 : vector<1x32xf32> to vector<32x32xf32>
    %34 = arith.mulf %16, %33 : vector<32x32xf32>
    %c0_8 = arith.constant 0 : index
    %c0_9 = arith.constant 0 : index
    %35 = vector.load %arg2[%c0_8, %c0_9] : memref<2x32xf32, #tpu.memory_space<vmem>>, vector<1x32xf32>
    %36 = vector.broadcast %35 : vector<1x32xf32> to vector<32x32xf32>
    %37 = arith.mulf %34, %36 : vector<32x32xf32>
    %c1 = arith.constant 1 : index
    %c0_10 = arith.constant 0 : index
    %38 = vector.load %arg2[%c1, %c0_10] : memref<2x32xf32, #tpu.memory_space<vmem>>, vector<1x32xf32>
    %39 = vector.broadcast %38 : vector<1x32xf32> to vector<32x32xf32>
    %40 = arith.addf %37, %39 : vector<32x32xf32>
    %cst_11 = arith.constant 0.000000e+00 : f32
    %41 = vector.broadcast %cst_11 : f32 to vector<32x32xf32>
    %42 = arith.maximumf %40, %41 : vector<32x32xf32>
    %c0_12 = arith.constant 0 : index
    %c0_13 = arith.constant 0 : index
    %43 = vector.load %arg3[%c0_12, %c0_13] : memref<32x32xf32, #tpu.memory_space<vmem>>, vector<32x32xf32>
    tpu.vector_store %arg3[%c0_12, %c0_13], %42 {strides = array<i32>} : memref<32x32xf32, #tpu.memory_space<vmem>>, vector<32x32xf32>,
    return
  }
}

module attributes {stable_mosaic.version = 11 : i64} {
  func.func @_mm_bias_tanh_t_kernel(%arg0: memref<4x72xf32, #tpu.memory_space<vmem>>, %arg1: memref<72x128xf32, #tpu.memory_space<vmem>>, %arg2: memref<4x1xf32, #tpu.memory_space<vmem>>, %arg3: memref<4x128xf32, #tpu.memory_space<vmem>>) attributes {dimension_semantics = [], scalar_prefetch = 0 : i64, scratch_operands = 0 : i64, tpu.core_type = #tpu.core_type<tc>} {
    %c0 = arith.constant 0 : index
    %c0_0 = arith.constant 0 : index
    %0 = vector.load %arg0[%c0, %c0_0] : memref<4x72xf32, #tpu.memory_space<vmem>>, vector<4x72xf32>
    %c0_1 = arith.constant 0 : index
    %c0_2 = arith.constant 0 : index
    %1 = vector.load %arg1[%c0_1, %c0_2] : memref<72x128xf32, #tpu.memory_space<vmem>>, vector<72x128xf32>
    %cst = arith.constant dense<0.000000e+00> : vector<4x128xf32>
    %2 = tpu.matmul %0, %1, %cst {dimension_numbers = #tpu.dot_dimension_numbers<[1], [0], [0], [1], [0, 0, 1, 1], [], []>} : vector<4x72xf32>, vector<72x128xf32>, vector<4x128xf32> -> vector<4x128xf32>
    %c0_3 = arith.constant 0 : index
    %c0_4 = arith.constant 0 : index
    %3 = vector.load %arg2[%c0_3, %c0_4] : memref<4x1xf32, #tpu.memory_space<vmem>>, vector<4x1xf32>
    %4 = vector.broadcast %3 : vector<4x1xf32> to vector<4x128xf32>
    %5 = arith.addf %2, %4 : vector<4x128xf32>
    %6 = math.tanh %5 : vector<4x128xf32>
    %c0_5 = arith.constant 0 : index
    %c0_6 = arith.constant 0 : index
    %7 = vector.load %arg3[%c0_5, %c0_6] : memref<4x128xf32, #tpu.memory_space<vmem>>, vector<4x128xf32>
    tpu.vector_store %arg3[%c0_5, %c0_6], %6 {strides = array<i32>} : memref<4x128xf32, #tpu.memory_space<vmem>>, vector<4x128xf32>,
    return
  }
}

</mosaic_0001>

<bundles_post_ra>
// kernel: _lambda_.4
= control target key start
LH: loop header
LB: loop body
LE: loop exit
PB: predicated region body
PF: predicated region fallthrough
CT: control target
= control target key end

     0   :  { %8 = vsyncpa [#allocation3], 0  ;;  %s363_s0 = inlined_call_operand.hbm [shape: f32[2,32], index: 0, kind: input, shape index: {}]   ;;  %s364_s1 = inlined_call_operand.hbm [shape: f32[32,128], index: 1, kind: input, shape index: {}]   ;;  %s365_s2 = inlined_call_operand.vmem [shape: f32[2,128], index: 2, kind: input, shape index: {}]   ;;  %s366_s3 = inlined_call_operand.vmem [shape: f32[2,128], index: 3, kind: output, shape index: {}]  }
   0x1   :  { %9 = vsyncpa [#allocation5], 0  ;;  %s298_s12 = smov [#allocation2]   ;;  %s299_s14 = smov [#allocation4]  }
   0x2   :  { %s16_s13 = sshll.u32 %s298_s12, 4  ;;  %s25_s15 = sshll.u32 %s299_s14, 4  ;;  %s17_s13 = int_to_ptr.vmem [resolvable:$true] %s16_s13  ;;  %s26_s15 = int_to_ptr.vmem [resolvable:$true] %s25_s15 }
   0x3   :  { %s262_s16 = scalar_lea.vmem %s17_s13, 32  ;;  %p267_p1 = scmp.lt.s32.totalorder %s17_s13, %s17_s13 }
   0x4   :  { %p263_p0 = scmp.ne.s32.totalorder %s17_s13, %s262_s16  ;;  %p268_p2 = scmp.lt.s32.totalorder %s262_s16, %s262_s16 }
   0x6   :  { %p269_p3 = por %p268_p2, %p267_p1 }
   0x8   :  { %p270_p4 = pnand %p269_p3, %p263_p0 }
   0xa   :  { %273 = shalt.err (!%p270_p4)
}
   0xb   :  { %19 = dma.hbm_to_vmem [thread:$0]  %s363_s0, 32, %s17_s13, [#allocation3]  }
   0xc   :  { %s282_s19 = scalar_lea.vmem %s26_s15, 512  ;;  %p287_p6 = scmp.lt.s32.totalorder %s26_s15, %s26_s15 }
   0xd   :  { %p283_p5 = scmp.ne.s32.totalorder %s26_s15, %s282_s19  ;;  %p288_p7 = scmp.lt.s32.totalorder %s282_s19, %s282_s19 }
   0xf   :  { %p289_p8 = por %p288_p7, %p287_p6 }
  0x11   :  { %p290_p9 = pnand %p289_p8, %p283_p5 }
  0x13   :  { %293 = shalt.err (!%p290_p9)
}
  0x14   :  { %s300_s20 = smov 128   ;;  %s301_s21 = smov 8  }
  0x15   :  { %31 = dma.hbm_to_vmem [thread:$0]  %s364_s1, 512, %s26_s15, [#allocation5], %s300_s20, %s300_s20, %s301_s21  }
  0x16   :  { %294 = dma.done.wait [#allocation3], 32  }
  0x17   :  { %295 = vsyncadd [#allocation3], 4294967264 }
  0x18   :  { %296 = dma.done.wait [#allocation5], 512  }
  0x19   :  { %297 = vsyncadd [#allocation5], 4294966784  ;;  %v302_v0 = vmov 0.0   ;;  %vm303_vm0 = vmmov 0   ;;  %v44_v1 = vld [vmem:[#allocation4 + $0x18] sm:$0xff]  ;;  %v43_v2 = vld [vmem:[#allocation4 + $0x10] sm:$0xff]  ;;  %v157_v22 = vlaneseq }
  0x1a   :  { %232 = vmatprep.subr.mxu0 %v302_v0  ;;  %240 = vmatprep.mubr.msk.f32.mxu0 %vm303_vm0, %v302_v0  ;;  %v42_v3 = vld [vmem:[#allocation4 + $0x8] sm:$0xff]  ;;  %v41_v4 = vld [vmem:[#allocation4] sm:$0xff]  ;;  %v40_v5 = vld [vmem:[#allocation2] sm:$0x3]  ;;  %vm45_vm1 = vcmask 261120   ;;  %vm119_vm2 = vcmask 1041408  }
  0x1b   :  { %233 = vmatpush3.msra.mxu0 %v44_v1  ;;  %s304_s0 = smov 32   ;;  %s305_s1 = smov 96   ;;  %v158_v23 = vshrl.u32 %v157_v22, 7  ;;  %vm153_vm3 = vcmask 523264   ;;  %vm155_vm4 = vcmask 785408  }
  0x1c   :  { %234 = vmatprep.subr.mxu0 %v302_v0  ;;  %s306_s24 = smov 64   ;;  %v225_v57 = vld [vmem:[%s365_s2] ss:$0 sm:$0xff]  ;;  %v226_v59 = vld [vmem:[%s365_s2 + $0x1] ss:$0 sm:$0xff] }
  0x1d   :  { %235 = vmatpush3.msra.mxu0 %v43_v2  ;;  %v159_v27 = vsub.s32 0, %v158_v23 }
  0x1e   :  { %236 = vmatprep.subr.mxu0 %v302_v0 }
  0x1f   :  { %237 = vmatpush3.msra.mxu0 %v42_v3 }
  0x20   :  { %238 = vmatprep.subr.mxu0 %v302_v0 }
  0x21   :  { %239 = vmatpush3.msra.mxu0 %v41_v4 }
  0x22   :  { %241 = vmatmul.mubr.msk.f32.vlgmr.msra.gmra.mxu0 %vm45_vm1, %v40_v5 }
  0xe2   :  { %v115_v6 = vpop.f32.mrf.mxu0 }
  0xe3   :  { %v120_v7 = vsel %vm119_vm2, %v115_v6, 0.0 }
  0xe4   :  { %v121_v8 = vrot.slane %v120_v7, 4  ;;  %v242_v9 = vpop.f32.mrf.mxu0 }
  0xe6   :  { %v122_v10 = vadd.f32 %v121_v8, %v120_v7 }
  0xe8   :  { %v123_v11 = vrot.slane %v122_v10, 2 }
  0xea   :  { %v124_v12 = vadd.f32 %v123_v11, %v122_v10 }
  0xec   :  { %v125_v13 = vrot.slane %v124_v12, 1 }
  0xee   :  { %v126_v14 = vadd.f32 %v125_v13, %v124_v12 }
  0xf0   :  { %136 = vrot.lane.b32.xlu1 %v126_v14, %s304_s0  ;;  %128 = vrot.lane.b32.xlu0 %v126_v14, %s305_s1 }
  0xf4   :  { %132 = vrot.lane.b32.xlu0 %v126_v14, %s306_s24 }
 0x162   :  { %v129_v15 = vpop.permute.xlu0 %128  ;;  %v137_v19 = vpop.permute.xlu1 %136 }
 0x163   :  { %v131_v16 = vadd.f32 %v129_v15, %v126_v14 }
 0x166   :  { %v133_v17 = vpop.permute.xlu0 %132 }
 0x167   :  { %v135_v18 = vadd.f32 %v133_v17, %v131_v16 }
 0x169   :  { %v139_v20 = vadd.f32 %v137_v19, %v135_v18 }
 0x16b   :  { %v141_v21 = vmul.f32 0.125, %v139_v20 }
 0x16d   :  { %146 = vrot.lane.b32.xlu0 %v141_v21, %s306_s24  ;;  %143 = vrot.lane.b32.xlu1 %v141_v21, %s304_s0 }
 0x171   :  { %149 = vrot.lane.b32.xlu1 %v141_v21, %s305_s1 }
 0x1df   :  { %v144_v24 = vpop.permute.xlu1 %143  ;;  %v147_v25 = vpop.permute.xlu0 %146 }
 0x1e0   :  { %v152_v26 = vsel %vm45_vm1, %v141_v21, %v144_v24 }
 0x1e1   :  { %v154_v28 = vsel %vm153_vm3, %v152_v26, %v147_v25 }
 0x1e3   :  { %v150_v29 = vpop.permute.xlu1 %149 }
 0x1e4   :  { %v156_v30 = vsel %vm155_vm4, %v154_v28, %v150_v29 }
 0x1e5   :  { %v160_v31 = vrot.slane %v156_v30, %v159_v27 }
 0x1e7   :  { %v161_v32 = vsub.f32 %v115_v6, %v160_v31 }
 0x1e9   :  { %v162_v33 = vmul.f32 %v161_v32, %v161_v32 }
 0x1eb   :  { %v163_v34 = vsel %vm119_vm2, %v162_v33, 0.0 }
 0x1ec   :  { %v164_v35 = vrot.slane %v163_v34, 4 }
 0x1ee   :  { %v165_v36 = vadd.f32 %v164_v35, %v163_v34 }
 0x1f0   :  { %v166_v37 = vrot.slane %v165_v36, 2 }
 0x1f2   :  { %v167_v38 = vadd.f32 %v166_v37, %v165_v36 }
 0x1f4   :  { %v168_v39 = vrot.slane %v167_v38, 1 }
 0x1f6   :  { %v169_v40 = vadd.f32 %v168_v39, %v167_v38 }
 0x1f8   :  { %175 = vrot.lane.b32.xlu1 %v169_v40, %s306_s24  ;;  %171 = vrot.lane.b32.xlu0 %v169_v40, %s305_s1 }
 0x1fc   :  { %179 = vrot.lane.b32.xlu0 %v169_v40, %s304_s0 }
 0x26a   :  { %v172_v41 = vpop.permute.xlu0 %171  ;;  %v176_v43 = vpop.permute.xlu1 %175 }
 0x26b   :  { %v174_v42 = vadd.f32 %v172_v41, %v169_v40 }
 0x26d   :  { %v178_v44 = vadd.f32 %v176_v43, %v174_v42 }
 0x26e   :  { %v180_v45 = vpop.permute.xlu0 %179 }
 0x26f   :  { %v182_v46 = vadd.f32 %v180_v45, %v178_v44 }
 0x271   :  { %v183_v47 = vmul.f32 0.125, %v182_v46 }
 0x273   :  { %188 = vrot.lane.b32.xlu0 %v183_v47, %s306_s24  ;;  %185 = vrot.lane.b32.xlu1 %v183_v47, %s304_s0 }
 0x277   :  { %191 = vrot.lane.b32.xlu1 %v183_v47, %s305_s1 }
 0x2e5   :  { %v186_v48 = vpop.permute.xlu1 %185  ;;  %v189_v49 = vpop.permute.xlu0 %188 }
 0x2e6   :  { %v194_v50 = vsel %vm45_vm1, %v183_v47, %v186_v48 }
 0x2e7   :  { %v195_v51 = vsel %vm153_vm3, %v194_v50, %v189_v49 }
 0x2e9   :  { %v192_v52 = vpop.permute.xlu1 %191 }
 0x2ea   :  { %v196_v53 = vsel %vm155_vm4, %v195_v51, %v192_v52 }
 0x2eb   :  { %v197_v54 = vadd.f32 1e-05, %v196_v53 }
 0x2ed   :  { %252 = vrsqrt.f32 %v197_v54 }
 0x2fa   :  { %v253_v55 = vpop.eup %252 }
 0x2fb   :  { %v202_v56 = vrot.slane %v253_v55, %v159_v27 }
 0x2fd   :  { %v203_v58 = vmul.f32 %v202_v56, %v161_v32 }
 0x2ff   :  { %v209_v60 = vmul.f32 %v225_v57, %v203_v58 }
 0x301   :  { %v215_v61 = vadd.f32 %v226_v59, %v209_v60 }
 0x303   :  { %v216_v62 = vmax.f32 %v215_v61, 0.0 }
 0x305   :  { %217 = vst [vmem:[%s366_s3] sm:$0x3] %v216_v62 }
 0x306   :  { %222 = vsyncpa [#allocation3], 1 }
 0x307   :  { %223 = vsyncpa [#allocation5], 1 }

// kernel: _lambda_.5
= control target key start
LH: loop header
LB: loop body
LE: loop exit
PB: predicated region body
PF: predicated region fallthrough
CT: control target
= control target key end

     0   :  { %8 = vsyncpa [#allocation3], 0  ;;  %s404_s12 = smov [#allocation2]   ;;  %s478_s0 = inlined_call_operand.vmem [shape: f32[8,288], index: 0, kind: input, shape index: {}]   ;;  %s479_s1 = inlined_call_operand.hbm [shape: f32[288,64], index: 1, kind: input, shape index: {}]   ;;  %s480_s2 = inlined_call_operand.vmem [shape: f32[2,64], index: 2, kind: input, shape index: {}]   ;;  %s481_s3 = inlined_call_operand.vmem [shape: f32[8,64], index: 3, kind: output, shape index: {}]  }
   0x1   :  { %s16_s13 = sshll.u32 %s404_s12, 4  ;;  %s17_s13 = int_to_ptr.vmem [resolvable:$true] %s16_s13 }
   0x2   :  { %s390_s14 = scalar_lea.vmem %s17_s13, 4608  ;;  %p395_p1 = scmp.lt.s32.totalorder %s17_s13, %s17_s13 }
   0x3   :  { %p391_p0 = scmp.ne.s32.totalorder %s17_s13, %s390_s14  ;;  %p396_p2 = scmp.lt.s32.totalorder %s390_s14, %s390_s14 }
   0x5   :  { %p397_p3 = por %p396_p2, %p395_p1 }
   0x7   :  { %p398_p4 = pnand %p397_p3, %p391_p0 }
   0x9   :  { %401 = shalt.err (!%p398_p4)
}
   0xa   :  { %s405_s15 = smov 128   ;;  %s406_s16 = smov 8  }
   0xb   :  { %22 = dma.hbm_to_vmem [thread:$0]  %s479_s1, 4608, %s17_s13, [#allocation3], %s405_s15, %s405_s15, %s406_s16  }
   0xc   :  { %402 = dma.done.wait [#allocation3], 4608  }
   0xd   :  { %403 = vsyncadd [#allocation3], 4294962688  ;;  %v407_v0 = vmov 0.0   ;;  %vm408_vm0 = vmmov 0   ;;  %v62_v1 = vld [vmem:[#allocation2 + $0xf8] sm:$0xff]  ;;  %v61_v3 = vld [vmem:[#allocation2 + $0xf0] sm:$0xff]  ;;  %v249_v60 = vlaneseq }
   0xe   :  { %358 = vmatprep.subr.mxu1 %v407_v0  ;;  %366 = vmatprep.mubr.msk.f32.mxu1 %vm408_vm0, %v407_v0  ;;  %v46_v2 = vld [vmem:[#allocation2 + $0x78] sm:$0xff]  ;;  %v45_v4 = vld [vmem:[#allocation2 + $0x70] sm:$0xff]  ;;  %v60_v5 = vld [vmem:[#allocation2 + $0xe8] sm:$0xff]  ;;  %vm67_vm1 = vcmask 261120   ;;  %vm211_vm2 = vcmask 523264   ;;  %s409_s24 = smov 80  }
   0xf   :  { %318 = vmatprep.subr.mxu0 %v62_v1  ;;  %v44_v6 = vld [vmem:[#allocation2 + $0x68] sm:$0xff]  ;;  %v59_v7 = vld [vmem:[#allocation2 + $0xe0] sm:$0xff]  ;;  %v58_v9 = vld [vmem:[#allocation2 + $0xd8] sm:$0xff]  ;;  %s411_s25 = smov 96   ;;  %s412_s26 = smov 32   ;;  %vm244_vm3 = vcmask 130048  }
  0x10   :  { %319 = vmatpush3.msra.mxu0 %v46_v2  ;;  %v43_v8 = vld [vmem:[#allocation2 + $0x60] sm:$0xff]  ;;  %v42_v10 = vld [vmem:[#allocation2 + $0x58] sm:$0xff]  ;;  %v57_v11 = vld [vmem:[#allocation2 + $0xd0] sm:$0xff]  ;;  %s413_s27 = smov 16   ;;  %s414_s28 = smov 48   ;;  %v250_v61 = vshrl.u32 %v249_v60, 7 }
  0x11   :  { %320 = vmatprep.subr.mxu0 %v61_v3  ;;  %v41_v12 = vld [vmem:[#allocation2 + $0x50] sm:$0xff]  ;;  %v66_v13 = vld [vmem:[#allocation2 + $0x118] sm:$0xff]  ;;  %v56_v14 = vld [vmem:[#allocation2 + $0xc8] sm:$0xff]  ;;  %vm247_vm4 = vcmask 392192  }
  0x12   :  { %321 = vmatpush3.msra.mxu0 %v45_v4  ;;  %359 = vmatpush3.msra.mxu1 %v66_v13  ;;  %v65_v15 = vld [vmem:[#allocation2 + $0x110] sm:$0xff]  ;;  %v40_v16 = vld [vmem:[#allocation2 + $0x48] sm:$0xff]  ;;  %v55_v18 = vld [vmem:[#allocation2 + $0xc0] sm:$0xff]  ;;  %v251_v1 = vsub.s32 0, %v250_v61 }
  0x13   :  { %322 = vmatprep.subr.mxu0 %v60_v5  ;;  %360 = vmatprep.subr.mxu1 %v407_v0  ;;  %v29_v17 = vld [vmem:[%s478_s0 + $0x8] sm:$0xff]  ;;  %v39_v20 = vld [vmem:[#allocation2 + $0x40] sm:$0xff]  ;;  %v54_v21 = vld [vmem:[#allocation2 + $0xb8] sm:$0xff] }
  0x14   :  { %323 = vmatpush3.msra.mxu0 %v44_v6  ;;  %361 = vmatpush3.msra.mxu1 %v65_v15  ;;  %v64_v19 = vld [vmem:[#allocation2 + $0x108] sm:$0xff]  ;;  %v63_v22 = vld [vmem:[#allocation2 + $0x100] sm:$0xff]  ;;  %v38_v23 = vld [vmem:[#allocation2 + $0x38] sm:$0xff] }
  0x15   :  { %324 = vmatprep.subr.mxu0 %v59_v7  ;;  %362 = vmatprep.subr.mxu1 %v407_v0  ;;  %v30_v24 = vld [vmem:[%s478_s0 + $0x10] sm:$0xff]  ;;  %v52_v27 = vld [vmem:[#allocation2 + $0xa8] sm:$0xff]  ;;  %v51_v29 = vld [vmem:[#allocation2 + $0xa0] sm:$0xff] }
  0x16   :  { %325 = vmatpush3.msra.mxu0 %v43_v8  ;;  %135 = vmatprep.mubr.f32.mxu0 %v29_v17  ;;  %v53_v25 = vld [vmem:[#allocation2 + $0xb0] sm:$0xff]  ;;  %v36_v28 = vld [vmem:[#allocation2 + $0x28] sm:$0xff]  ;;  %v35_v30 = vld [vmem:[#allocation2 + $0x20] sm:$0xff] }
  0x17   :  { %326 = vmatprep.subr.mxu0 %v58_v9  ;;  %363 = vmatpush3.msra.mxu1 %v64_v19  ;;  %v37_v26 = vld [vmem:[#allocation2 + $0x30] sm:$0xff]  ;;  %v50_v31 = vld [vmem:[#allocation2 + $0x98] sm:$0xff]  ;;  %v48_v35 = vld [vmem:[#allocation2 + $0x88] sm:$0xff] }
  0x18   :  { %327 = vmatpush3.msra.mxu0 %v42_v10  ;;  %364 = vmatprep.subr.mxu1 %v407_v0  ;;  %v34_v32 = vld [vmem:[#allocation2 + $0x18] sm:$0xff]  ;;  %v49_v33 = vld [vmem:[#allocation2 + $0x90] sm:$0xff]  ;;  %v32_v36 = vld [vmem:[#allocation2 + $0x8] sm:$0xff] }
  0x19   :  { %328 = vmatprep.subr.mxu0 %v57_v11  ;;  %365 = vmatpush3.msra.mxu1 %v63_v22  ;;  %v33_v34 = vld [vmem:[#allocation2 + $0x10] sm:$0xff]  ;;  %v47_v37 = vld [vmem:[#allocation2 + $0x80] sm:$0xff] }
  0x1a   :  { %329 = vmatpush3.msra.mxu0 %v41_v12  ;;  %367 = vmatmul.mubr.msk.f32.vlgmr.msra.gmra.mxu1 %vm67_vm1, %v30_v24  ;;  %v31_v38 = vld [vmem:[#allocation2] sm:$0xff] }
  0x1b   :  { %330 = vmatprep.subr.mxu0 %v56_v14  ;;  %v28_v39 = vld [vmem:[%s478_s0] sm:$0xff]  ;;  %s410_s0 = smov 112  }
  0x1c   :  { %331 = vmatpush3.msra.mxu0 %v40_v16 }
  0x1d   :  { %332 = vmatprep.subr.mxu0 %v55_v18 }
  0x1e   :  { %333 = vmatpush3.msra.mxu0 %v39_v20 }
  0x1f   :  { %334 = vmatprep.subr.mxu0 %v54_v21 }
  0x20   :  { %335 = vmatpush3.msra.mxu0 %v38_v23 }
  0x21   :  { %336 = vmatprep.subr.mxu0 %v53_v25 }
  0x22   :  { %337 = vmatpush3.msra.mxu0 %v37_v26 }
  0x23   :  { %338 = vmatprep.subr.mxu0 %v52_v27 }
  0x24   :  { %339 = vmatpush3.msra.mxu0 %v36_v28 }
  0x25   :  { %340 = vmatprep.subr.mxu0 %v51_v29 }
  0x26   :  { %341 = vmatpush3.msra.mxu0 %v35_v30 }
  0x27   :  { %342 = vmatprep.subr.mxu0 %v50_v31  ;;  %v316_v31 = vld [vmem:[%s480_s2] ss:$0 sm:$0xff] }
  0x28   :  { %343 = vmatpush3.msra.mxu0 %v34_v32 }
  0x29   :  { %344 = vmatprep.subr.mxu0 %v49_v33  ;;  %v317_v33 = vld [vmem:[%s480_s2 + $0x1] ss:$0 sm:$0xff] }
  0x2a   :  { %345 = vmatpush3.msra.mxu0 %v33_v34 }
  0x2b   :  { %346 = vmatprep.subr.mxu0 %v48_v35 }
  0x2c   :  { %347 = vmatpush3.msra.mxu0 %v32_v36 }
  0x2d   :  { %348 = vmatprep.subr.mxu0 %v47_v37 }
  0x2e   :  { %349 = vmatpush3.msra.mxu0 %v31_v38 }
  0x2f   :  { %136 = vmatmul.mubr.f32.vlgmr.msra.gmra.mxu0 %v28_v39 }
  0xda   :  { %v207_v40 = vpop.f32.mrf.mxu1 }
  0xdc   :  { %v368_v41 = vpop.f32.mrf.mxu1 }
  0xef   :  { %v350_v42 = vpop.f32.mrf.mxu0 }
  0xf1   :  { %v351_v43 = vpop.f32.mrf.mxu0 }
  0xf2   :  { %v352_v44 = vadd.f32 %v351_v43, %v350_v42 }
  0xf4   :  { %v208_v45 = vadd.f32 %v352_v44, %v207_v40 }
  0xf6   :  { %v212_v46 = vsel %vm211_vm2, %v208_v45, 0.0 }
  0xf7   :  { %v213_v47 = vrot.slane %v212_v46, 4 }
  0xf9   :  { %v214_v48 = vadd.f32 %v213_v47, %v212_v46 }
  0xfb   :  { %v215_v49 = vrot.slane %v214_v48, 2 }
  0xfd   :  { %v216_v50 = vadd.f32 %v215_v49, %v214_v48 }
  0xff   :  { %v217_v51 = vrot.slane %v216_v50, 1 }
 0x101   :  { %v218_v52 = vadd.f32 %v217_v51, %v216_v50 }
 0x103   :  { %228 = vrot.lane.b32.xlu1 %v218_v52, %s409_s24  ;;  %220 = vrot.lane.b32.xlu0 %v218_v52, %s410_s0 }
 0x107   :  { %224 = vrot.lane.b32.xlu0 %v218_v52, %s411_s25 }
 0x175   :  { %v221_v53 = vpop.permute.xlu0 %220  ;;  %v229_v57 = vpop.permute.xlu1 %228 }
 0x176   :  { %v223_v54 = vadd.f32 %v221_v53, %v218_v52 }
 0x179   :  { %v225_v55 = vpop.permute.xlu0 %224 }
 0x17a   :  { %v227_v56 = vadd.f32 %v225_v55, %v223_v54 }
 0x17c   :  { %v231_v58 = vadd.f32 %v229_v57, %v227_v56 }
 0x17e   :  { %v233_v59 = vmul.f32 0.03125, %v231_v58 }
 0x180   :  { %238 = vrot.lane.b32.xlu0 %v233_v59, %s412_s26  ;;  %235 = vrot.lane.b32.xlu1 %v233_v59, %s413_s27 }
 0x184   :  { %241 = vrot.lane.b32.xlu1 %v233_v59, %s414_s28 }
 0x1f2   :  { %v236_v62 = vpop.permute.xlu1 %235  ;;  %v239_v63 = vpop.permute.xlu0 %238 }
 0x1f3   :  { %v245_v0 = vsel %vm244_vm3, %v233_v59, %v236_v62 }
 0x1f4   :  { %v246_v2 = vsel %vm67_vm1, %v245_v0, %v239_v63 }
 0x1f6   :  { %v242_v3 = vpop.permute.xlu1 %241 }
 0x1f7   :  { %v248_v4 = vsel %vm247_vm4, %v246_v2, %v242_v3 }
 0x1f8   :  { %v252_v5 = vrot.slane %v248_v4, %v251_v1 }
 0x1fa   :  { %v253_v6 = vsub.f32 %v208_v45, %v252_v5 }
 0x1fc   :  { %v254_v7 = vmul.f32 %v253_v6, %v253_v6 }
 0x1fe   :  { %v255_v8 = vsel %vm211_vm2, %v254_v7, 0.0 }
 0x1ff   :  { %v256_v9 = vrot.slane %v255_v8, 4 }
 0x201   :  { %v257_v10 = vadd.f32 %v256_v9, %v255_v8 }
 0x203   :  { %v258_v11 = vrot.slane %v257_v10, 2 }
 0x205   :  { %v259_v12 = vadd.f32 %v258_v11, %v257_v10 }
 0x207   :  { %v260_v13 = vrot.slane %v259_v12, 1 }
 0x209   :  { %v261_v14 = vadd.f32 %v260_v13, %v259_v12 }
 0x20b   :  { %267 = vrot.lane.b32.xlu1 %v261_v14, %s411_s25  ;;  %263 = vrot.lane.b32.xlu0 %v261_v14, %s410_s0 }
 0x20f   :  { %271 = vrot.lane.b32.xlu0 %v261_v14, %s409_s24 }
 0x27d   :  { %v264_v15 = vpop.permute.xlu0 %263  ;;  %v268_v17 = vpop.permute.xlu1 %267 }
 0x27e   :  { %v266_v16 = vadd.f32 %v264_v15, %v261_v14 }
 0x280   :  { %v270_v18 = vadd.f32 %v268_v17, %v266_v16 }
 0x281   :  { %v272_v19 = vpop.permute.xlu0 %271 }
 0x282   :  { %v274_v20 = vadd.f32 %v272_v19, %v270_v18 }
 0x284   :  { %v275_v21 = vmul.f32 0.03125, %v274_v20 }
 0x286   :  { %280 = vrot.lane.b32.xlu0 %v275_v21, %s412_s26  ;;  %277 = vrot.lane.b32.xlu1 %v275_v21, %s413_s27 }
 0x28a   :  { %283 = vrot.lane.b32.xlu1 %v275_v21, %s414_s28 }
 0x2f8   :  { %v278_v22 = vpop.permute.xlu1 %277  ;;  %v281_v23 = vpop.permute.xlu0 %280 }
 0x2f9   :  { %v286_v24 = vsel %vm244_vm3, %v275_v21, %v278_v22 }
 0x2fa   :  { %v287_v25 = vsel %vm67_vm1, %v286_v24, %v281_v23 }
 0x2fc   :  { %v284_v26 = vpop.permute.xlu1 %283 }
 0x2fd   :  { %v288_v27 = vsel %vm247_vm4, %v287_v25, %v284_v26 }
 0x2fe   :  { %v289_v28 = vadd.f32 1e-05, %v288_v27 }
 0x300   :  { %380 = vrsqrt.f32 %v289_v28 }
 0x30d   :  { %v381_v29 = vpop.eup %380 }
 0x30e   :  { %v294_v30 = vrot.slane %v381_v29, %v251_v1 }
 0x310   :  { %v295_v32 = vmul.f32 %v294_v30, %v253_v6 }
 0x312   :  { %v301_v34 = vmul.f32 %v316_v31, %v295_v32 }
 0x314   :  { %v307_v35 = vadd.f32 %v317_v33, %v301_v34 }
 0x316   :  { %v308_v36 = vmax.f32 %v307_v35, 0.0 }
 0x318   :  { %309 = vst.msk [vmem:[%s481_s3] sm:$0xff] %vm211_vm2, %v308_v36 }
 0x319   :  { %314 = vsyncpa [#allocation3], 1 }

// kernel: _lambda_.6
= control target key start
LH: loop header
LB: loop body
LE: loop exit
PB: predicated region body
PF: predicated region fallthrough
CT: control target
= control target key end

     0   :  { %v325_v0 = vmov 0.0   ;;  %vm40_vm0 = vcmask 130048   ;;  %vm138_vm1 = vcmask 261120   ;;  %s327_s9 = smov 120   ;;  %s328_s10 = smov 112   ;;  %v182_v55 = vlaneseq  ;;  %s518_s1 = inlined_call_operand.vmem [shape: f32[144,32], index: 1, kind: input, shape index: {}]   ;;  %s519_s0 = inlined_call_operand.vmem [shape: f32[32,144], index: 0, kind: input, shape index: {}]   ;;  %s520_s2 = inlined_call_operand.vmem [shape: f32[2,32], index: 2, kind: input, shape index: {}]   ;;  %s521_s3 = inlined_call_operand.vmem [shape: f32[32,32], index: 3, kind: output, shape index: {}]  }
   0x1   :  { %53 = vmatprep.subr.mxu0 %v325_v0  ;;  %v37_v1 = vld [vmem:[%s518_s1 + $0x78] sm:$0xff]  ;;  %280 = vmatprep.subr.mxu1 %v325_v0  ;;  %v36_v2 = vld [vmem:[%s518_s1 + $0x70] sm:$0xff]  ;;  %v35_v3 = vld [vmem:[%s518_s1 + $0x68] sm:$0xff]  ;;  %s329_s11 = smov 16   ;;  %s330_s12 = smov 8   ;;  %vm177_vm2 = vcmask 64512  }
   0x2   :  { %54 = vmatpush1.msra.mxu0 %v37_v1  ;;  %298 = vmatpush1.msra.mxu1 %v37_v1  ;;  %v34_v4 = vld [vmem:[%s518_s1 + $0x60] sm:$0xff]  ;;  %v33_v5 = vld [vmem:[%s518_s1 + $0x58] sm:$0xff]  ;;  %v32_v6 = vld [vmem:[%s518_s1 + $0x50] sm:$0xff]  ;;  %s331_s13 = smov 24   ;;  %v183_v56 = vshrl.u32 %v182_v55, 7  ;;  %vm180_vm3 = vcmask 195584  }
   0x3   :  { %55 = vmatprep.subr.mxu0 %v325_v0  ;;  %281 = vmatprep.subr.mxu1 %v325_v0  ;;  %v31_v7 = vld [vmem:[%s518_s1 + $0x48] sm:$0xff]  ;;  %v30_v8 = vld [vmem:[%s518_s1 + $0x40] sm:$0xff]  ;;  %v29_v9 = vld [vmem:[%s518_s1 + $0x38] sm:$0xff] }
   0x4   :  { %56 = vmatpush1.msra.mxu0 %v36_v2  ;;  %299 = vmatpush1.msra.mxu1 %v36_v2  ;;  %v28_v10 = vld [vmem:[%s518_s1 + $0x30] sm:$0xff]  ;;  %v27_v11 = vld [vmem:[%s518_s1 + $0x28] sm:$0xff]  ;;  %v26_v12 = vld [vmem:[%s518_s1 + $0x20] sm:$0xff]  ;;  %v184_v60 = vsub.s32 0, %v183_v56 }
   0x5   :  { %57 = vmatprep.subr.mxu0 %v325_v0  ;;  %282 = vmatprep.subr.mxu1 %v325_v0  ;;  %v25_v13 = vld [vmem:[%s518_s1 + $0x18] sm:$0xff]  ;;  %v24_v14 = vld [vmem:[%s518_s1 + $0x10] sm:$0xff]  ;;  %v23_v15 = vld [vmem:[%s518_s1 + $0x8] sm:$0xff] }
   0x6   :  { %58 = vmatpush1.msra.mxu0 %v35_v3  ;;  %300 = vmatpush1.msra.mxu1 %v35_v3  ;;  %v22_v16 = vld [vmem:[%s518_s1] sm:$0xff]  ;;  %v39_v17 = vld [vmem:[%s518_s1 + $0x88] sm:$0xff]  ;;  %v17_v22 = vld [vmem:[%s519_s0 + $0x18] sm:$0xff] }
   0x7   :  { %59 = vmatprep.subr.mxu0 %v325_v0  ;;  %283 = vmatprep.subr.mxu1 %v325_v0  ;;  %v15_v18 = vld [vmem:[%s519_s0 + $0x8] sm:$0xff]  ;;  %v38_v19 = vld [vmem:[%s518_s1 + $0x80] sm:$0xff]  ;;  %v21_v24 = vld [vmem:[%s519_s0 + $0x38] sm:$0xff] }
   0x8   :  { %60 = vmatpush1.msra.mxu0 %v34_v4  ;;  %301 = vmatpush1.msra.mxu1 %v34_v4  ;;  %v14_v20 = vld [vmem:[%s519_s0] sm:$0xff]  ;;  %v19_v21 = vld [vmem:[%s519_s0 + $0x28] sm:$0xff]  ;;  %v16_v25 = vld [vmem:[%s519_s0 + $0x10] sm:$0xff] }
   0x9   :  { %61 = vmatprep.subr.mxu0 %v325_v0  ;;  %284 = vmatprep.subr.mxu1 %v325_v0  ;;  %v18_v23 = vld [vmem:[%s519_s0 + $0x20] sm:$0xff]  ;;  %v20_v26 = vld [vmem:[%s519_s0 + $0x30] sm:$0xff]  ;;  %s326_s0 = smov 104  }
   0xa   :  { %62 = vmatpush1.msra.mxu0 %v33_v5  ;;  %302 = vmatpush1.msra.mxu1 %v33_v5 }
   0xb   :  { %63 = vmatprep.subr.mxu0 %v325_v0  ;;  %285 = vmatprep.subr.mxu1 %v325_v0 }
   0xc   :  { %64 = vmatpush1.msra.mxu0 %v32_v6  ;;  %303 = vmatpush1.msra.mxu1 %v32_v6 }
   0xd   :  { %65 = vmatprep.subr.mxu0 %v325_v0  ;;  %286 = vmatprep.subr.mxu1 %v325_v0 }
   0xe   :  { %66 = vmatpush1.msra.mxu0 %v31_v7  ;;  %304 = vmatpush1.msra.mxu1 %v31_v7 }
   0xf   :  { %67 = vmatprep.subr.mxu0 %v325_v0  ;;  %287 = vmatprep.subr.mxu1 %v325_v0 }
  0x10   :  { %68 = vmatpush1.msra.mxu0 %v30_v8  ;;  %305 = vmatpush1.msra.mxu1 %v30_v8 }
  0x11   :  { %69 = vmatprep.subr.mxu0 %v325_v0  ;;  %288 = vmatprep.subr.mxu1 %v325_v0 }
  0x12   :  { %70 = vmatpush1.msra.mxu0 %v29_v9  ;;  %306 = vmatpush1.msra.mxu1 %v29_v9 }
  0x13   :  { %71 = vmatprep.subr.mxu0 %v325_v0  ;;  %289 = vmatprep.subr.mxu1 %v325_v0 }
  0x14   :  { %72 = vmatpush1.msra.mxu0 %v28_v10  ;;  %307 = vmatpush1.msra.mxu1 %v28_v10 }
  0x15   :  { %73 = vmatprep.subr.mxu0 %v325_v0  ;;  %290 = vmatprep.subr.mxu1 %v325_v0 }
  0x16   :  { %74 = vmatpush1.msra.mxu0 %v27_v11  ;;  %308 = vmatpush1.msra.mxu1 %v27_v11 }
  0x17   :  { %75 = vmatprep.subr.mxu0 %v325_v0  ;;  %291 = vmatprep.subr.mxu1 %v325_v0 }
  0x18   :  { %76 = vmatpush1.msra.mxu0 %v26_v12  ;;  %309 = vmatpush1.msra.mxu1 %v26_v12 }
  0x19   :  { %77 = vmatprep.subr.mxu0 %v325_v0  ;;  %292 = vmatprep.subr.mxu1 %v325_v0 }
  0x1a   :  { %78 = vmatpush1.msra.mxu0 %v25_v13  ;;  %310 = vmatpush1.msra.mxu1 %v25_v13 }
  0x1b   :  { %79 = vmatprep.subr.mxu0 %v325_v0  ;;  %293 = vmatprep.subr.mxu1 %v325_v0 }
  0x1c   :  { %80 = vmatpush1.msra.mxu0 %v24_v14  ;;  %311 = vmatpush1.msra.mxu1 %v24_v14 }
  0x1d   :  { %81 = vmatprep.subr.mxu0 %v325_v0  ;;  %294 = vmatprep.subr.mxu1 %v325_v0 }
  0x1e   :  { %82 = vmatpush1.msra.mxu0 %v23_v15  ;;  %312 = vmatpush1.msra.mxu1 %v23_v15 }
  0x1f   :  { %83 = vmatprep.subr.mxu0 %v325_v0  ;;  %295 = vmatprep.subr.mxu1 %v325_v0 }
  0x20   :  { %84 = vmatpush1.msra.mxu0 %v22_v16  ;;  %313 = vmatpush1.msra.mxu1 %v22_v16 }
  0x21   :  { %113 = vmatprep.subr.mxu0 %v325_v0  ;;  %296 = vmatprep.subr.mxu1 %v325_v0 }
  0x22   :  { %114 = vmatpush2.msra.mxu0 %v39_v17  ;;  %314 = vmatpush2.msra.mxu1 %v39_v17 }
  0x23   :  { %115 = vmatprep.subr.mxu0 %v325_v0  ;;  %274 = vmatprep.mubr.msk.f32.mxu0 %vm40_vm0, %v15_v18 }
  0x24   :  { %116 = vmatpush2.msra.mxu0 %v38_v19  ;;  %297 = vmatprep.subr.mxu1 %v325_v0 }
  0x25   :  { %118 = vmatmul.mubr.f32.vlgmr.msra.gmra.mxu0 %v14_v20  ;;  %315 = vmatpush2.msra.mxu1 %v38_v19 }
  0x26   :  { %276 = vmatprep.mubr.msk.f32.mxu1 %vm40_vm0, %v19_v21  ;;  %275 = vmatprep.mubr.msk.f32.mxu0 %vm40_vm0, %v17_v22 }
  0x27   :  { %128 = vmatmul.mubr.f32.vlgmr.msra.gmra.mxu1 %v18_v23 }
  0x28   :  { %277 = vmatprep.mubr.msk.f32.mxu1 %vm40_vm0, %v21_v24 }
  0x29   :  { %123 = vmatmul.mubr.f32.gmra.mxu0 %v16_v25 }
  0x2b   :  { %133 = vmatmul.mubr.f32.gmra.mxu1 %v20_v26 }
  0xe5   :  { %v119_v27 = vpop.f32.mrf.mxu0 }
  0xe6   :  { %v139_v32 = vsel %vm138_vm1, %v119_v27, 0.0 }
  0xe7   :  { %v121_v28 = vpop.f32.mrf.mxu0  ;;  %v129_v29 = vpop.f32.mrf.mxu1 }
  0xe8   :  { %v142_v37 = vsel %vm138_vm1, %v129_v29, 0.0 }
  0xe9   :  { %v124_v30 = vpop.f32.mrf.mxu0  ;;  %v131_v31 = vpop.f32.mrf.mxu1 }
  0xea   :  { %v140_v33 = vsel %vm138_vm1, %v124_v30, 0.0 }
  0xeb   :  { %v141_v34 = vadd.f32 %v140_v33, %v139_v32  ;;  %v126_v35 = vpop.f32.mrf.mxu0  ;;  %v134_v36 = vpop.f32.mrf.mxu1 }
  0xec   :  { %v144_v38 = vsel %vm138_vm1, %v134_v36, 0.0 }
  0xed   :  { %v143_v39 = vadd.f32 %v142_v37, %v141_v34  ;;  %v136_v40 = vpop.f32.mrf.mxu1 }
  0xef   :  { %v145_v41 = vadd.f32 %v144_v38, %v143_v39  ;;  %v278_v38 = vld [vmem:[%s520_s2] ss:$0 sm:$0xff] }
  0xf1   :  { %v146_v42 = vrot.slane %v145_v41, 4 }
  0xf3   :  { %v147_v43 = vadd.f32 %v146_v42, %v145_v41 }
  0xf5   :  { %v148_v44 = vrot.slane %v147_v43, 2 }
  0xf7   :  { %v149_v45 = vadd.f32 %v148_v44, %v147_v43  ;;  %v279_v43 = vld [vmem:[%s520_s2 + $0x1] ss:$0 sm:$0xff] }
  0xf9   :  { %v150_v46 = vrot.slane %v149_v45, 1 }
  0xfb   :  { %v151_v47 = vadd.f32 %v150_v46, %v149_v45 }
  0xfd   :  { %161 = vrot.lane.b32.xlu1 %v151_v47, %s326_s0  ;;  %153 = vrot.lane.b32.xlu0 %v151_v47, %s327_s9 }
 0x101   :  { %157 = vrot.lane.b32.xlu0 %v151_v47, %s328_s10 }
 0x16f   :  { %v154_v48 = vpop.permute.xlu0 %153  ;;  %v162_v52 = vpop.permute.xlu1 %161 }
 0x170   :  { %v156_v49 = vadd.f32 %v154_v48, %v151_v47 }
 0x173   :  { %v158_v50 = vpop.permute.xlu0 %157 }
 0x174   :  { %v160_v51 = vadd.f32 %v158_v50, %v156_v49 }
 0x176   :  { %v164_v53 = vadd.f32 %v162_v52, %v160_v51 }
 0x178   :  { %v166_v54 = vmul.f32 0.0078125, %v164_v53 }
 0x17a   :  { %171 = vrot.lane.b32.xlu0 %v166_v54, %s329_s11  ;;  %168 = vrot.lane.b32.xlu1 %v166_v54, %s330_s12 }
 0x17e   :  { %174 = vrot.lane.b32.xlu1 %v166_v54, %s331_s13 }
 0x1ec   :  { %v169_v57 = vpop.permute.xlu1 %168  ;;  %v172_v58 = vpop.permute.xlu0 %171 }
 0x1ed   :  { %v178_v59 = vsel %vm177_vm2, %v166_v54, %v169_v57 }
 0x1ee   :  { %v179_v61 = vsel %vm40_vm0, %v178_v59, %v172_v58 }
 0x1f0   :  { %v175_v62 = vpop.permute.xlu1 %174 }
 0x1f1   :  { %v181_v63 = vsel %vm180_vm3, %v179_v61, %v175_v62 }
 0x1f2   :  { %v185_v0 = vrot.slane %v181_v63, %v184_v60 }
 0x1f4   :  { %v186_v1 = vsub.f32 %v119_v27, %v185_v0  ;;  %v187_v2 = vsub.f32 %v124_v30, %v185_v0  ;;  %v188_v3 = vsub.f32 %v129_v29, %v185_v0  ;;  %v189_v4 = vsub.f32 %v134_v36, %v185_v0 }
 0x1f6   :  { %v190_v5 = vmul.f32 %v186_v1, %v186_v1  ;;  %v191_v6 = vmul.f32 %v187_v2, %v187_v2  ;;  %v192_v7 = vmul.f32 %v188_v3, %v188_v3  ;;  %v193_v8 = vmul.f32 %v189_v4, %v189_v4 }
 0x1f8   :  { %v194_v9 = vsel %vm138_vm1, %v190_v5, 0.0  ;;  %v195_v10 = vsel %vm138_vm1, %v191_v6, 0.0  ;;  %v197_v12 = vsel %vm138_vm1, %v192_v7, 0.0  ;;  %v199_v14 = vsel %vm138_vm1, %v193_v8, 0.0 }
 0x1f9   :  { %v196_v11 = vadd.f32 %v195_v10, %v194_v9 }
 0x1fb   :  { %v198_v13 = vadd.f32 %v197_v12, %v196_v11 }
 0x1fd   :  { %v200_v15 = vadd.f32 %v199_v14, %v198_v13 }
 0x1ff   :  { %v201_v16 = vrot.slane %v200_v15, 4 }
 0x201   :  { %v202_v17 = vadd.f32 %v201_v16, %v200_v15 }
 0x203   :  { %v203_v18 = vrot.slane %v202_v17, 2 }
 0x205   :  { %v204_v19 = vadd.f32 %v203_v18, %v202_v17 }
 0x207   :  { %v205_v20 = vrot.slane %v204_v19, 1 }
 0x209   :  { %v206_v21 = vadd.f32 %v205_v20, %v204_v19 }
 0x20b   :  { %212 = vrot.lane.b32.xlu1 %v206_v21, %s328_s10  ;;  %208 = vrot.lane.b32.xlu0 %v206_v21, %s327_s9 }
 0x20f   :  { %216 = vrot.lane.b32.xlu0 %v206_v21, %s326_s0 }
 0x27d   :  { %v209_v22 = vpop.permute.xlu0 %208  ;;  %v213_v24 = vpop.permute.xlu1 %212 }
 0x27e   :  { %v211_v23 = vadd.f32 %v209_v22, %v206_v21 }
 0x280   :  { %v215_v25 = vadd.f32 %v213_v24, %v211_v23 }
 0x281   :  { %v217_v26 = vpop.permute.xlu0 %216 }
 0x282   :  { %v219_v27 = vadd.f32 %v217_v26, %v215_v25 }
 0x284   :  { %v220_v28 = vmul.f32 0.0078125, %v219_v27 }
 0x286   :  { %225 = vrot.lane.b32.xlu0 %v220_v28, %s329_s11  ;;  %222 = vrot.lane.b32.xlu1 %v220_v28, %s330_s12 }
 0x28a   :  { %228 = vrot.lane.b32.xlu1 %v220_v28, %s331_s13 }
 0x2f8   :  { %v223_v29 = vpop.permute.xlu1 %222  ;;  %v226_v30 = vpop.permute.xlu0 %225 }
 0x2f9   :  { %v231_v31 = vsel %vm177_vm2, %v220_v28, %v223_v29 }
 0x2fa   :  { %v232_v32 = vsel %vm40_vm0, %v231_v31, %v226_v30 }
 0x2fc   :  { %v229_v33 = vpop.permute.xlu1 %228 }
 0x2fd   :  { %v233_v34 = vsel %vm180_vm3, %v232_v32, %v229_v33 }
 0x2fe   :  { %v234_v35 = vadd.f32 1e-05, %v233_v34 }
 0x300   :  { %323 = vrsqrt.f32 %v234_v35 }
 0x30d   :  { %v324_v36 = vpop.eup %323 }
 0x30e   :  { %v239_v37 = vrot.slane %v324_v36, %v184_v60 }
 0x310   :  { %v240_v39 = vmul.f32 %v239_v37, %v186_v1  ;;  %v241_v40 = vmul.f32 %v239_v37, %v187_v2  ;;  %v242_v41 = vmul.f32 %v239_v37, %v188_v3  ;;  %v243_v42 = vmul.f32 %v239_v37, %v189_v4 }
 0x312   :  { %v249_v44 = vmul.f32 %v278_v38, %v240_v39  ;;  %v250_v45 = vmul.f32 %v278_v38, %v241_v40  ;;  %v251_v46 = vmul.f32 %v278_v38, %v242_v41  ;;  %v252_v47 = vmul.f32 %v278_v38, %v243_v42 }
 0x314   :  { %v258_v48 = vadd.f32 %v279_v43, %v249_v44  ;;  %v259_v49 = vadd.f32 %v279_v43, %v250_v45  ;;  %v260_v50 = vadd.f32 %v279_v43, %v251_v46  ;;  %v261_v51 = vadd.f32 %v279_v43, %v252_v47 }
 0x316   :  { %v262_v52 = vmax.f32 %v258_v48, 0.0  ;;  %v263_v53 = vmax.f32 %v259_v49, 0.0  ;;  %v264_v54 = vmax.f32 %v260_v50, 0.0  ;;  %v265_v55 = vmax.f32 %v261_v51, 0.0 }
 0x318   :  { %266 = vst.msk [vmem:[%s521_s3] sm:$0xff] %vm138_vm1, %v262_v52  ;;  %267 = vst.msk [vmem:[%s521_s3 + $0x8] sm:$0xff] %vm138_vm1, %v263_v53 }
 0x319   :  { %268 = vst.msk [vmem:[%s521_s3 + $0x10] sm:$0xff] %vm138_vm1, %v264_v54  ;;  %269 = vst.msk [vmem:[%s521_s3 + $0x18] sm:$0xff] %vm138_vm1, %v265_v55 }

// kernel: _lambda_.7
= control target key start
LH: loop header
LB: loop body
LE: loop exit
PB: predicated region body
PF: predicated region fallthrough
CT: control target
= control target key end

     0   :  { %v148_v0 = vmov 0.0   ;;  %vm149_vm0 = vmmov 0   ;;  %v150_v3 = vmov 0   ;;  %vm30_vm1 = vcmask 588800   ;;  %s207_s1 = inlined_call_operand.vmem [shape: f32[72,128], index: 1, kind: input, shape index: {}]   ;;  %s208_s2 = inlined_call_operand.vmem [shape: f32[4,1], index: 2, kind: input, shape index: {}]   ;;  %s209_s0 = inlined_call_operand.vmem [shape: f32[4,72], index: 0, kind: input, shape index: {}]   ;;  %s210_s3 = inlined_call_operand.vmem [shape: f32[4,128], index: 3, kind: output, shape index: {}]  }
   0x1   :  { %121 = vmatprep.subr.mxu0 %v148_v0  ;;  %v23_v1 = vld [vmem:[%s207_s1 + $0x40] sm:$0xff]  ;;  %v22_v2 = vld [vmem:[%s207_s1 + $0x38] sm:$0xff]  ;;  %139 = vmatprep.mubr.msk.f32.mxu0 %vm149_vm0, %v148_v0  ;;  %v21_v4 = vld [vmem:[%s207_s1 + $0x30] sm:$0xff] }
   0x2   :  { %122 = vmatpush3.msra.mxu0 %v23_v1  ;;  %145 = vset.pattern.permute.xlu0 %v150_v3  ;;  %v24_v5 = vld [vmem:[%s208_s2] sm:$0xf]  ;;  %v20_v6 = vld [vmem:[%s207_s1 + $0x28] sm:$0xff]  ;;  %v18_v8 = vld [vmem:[%s207_s1 + $0x18] sm:$0xff] }
   0x3   :  { %123 = vmatprep.subr.mxu0 %v148_v0  ;;  %27 = vperm.xlu0 %145, %v24_v5   ;;  %v19_v7 = vld [vmem:[%s207_s1 + $0x20] sm:$0xff]  ;;  %v17_v9 = vld [vmem:[%s207_s1 + $0x10] sm:$0xff]  ;;  %v16_v10 = vld [vmem:[%s207_s1 + $0x8] sm:$0xff] }
   0x4   :  { %124 = vmatpush3.msra.mxu0 %v22_v2  ;;  %v15_v11 = vld [vmem:[%s207_s1] sm:$0xff] }
   0x5   :  { %125 = vmatprep.subr.mxu0 %v148_v0  ;;  %v14_v12 = vld [vmem:[%s209_s0] sm:$0xf] }
   0x6   :  { %126 = vmatpush3.msra.mxu0 %v21_v4 }
   0x7   :  { %127 = vmatprep.subr.mxu0 %v148_v0 }
   0x8   :  { %128 = vmatpush3.msra.mxu0 %v20_v6 }
   0x9   :  { %129 = vmatprep.subr.mxu0 %v148_v0 }
   0xa   :  { %130 = vmatpush3.msra.mxu0 %v19_v7 }
   0xb   :  { %131 = vmatprep.subr.mxu0 %v148_v0 }
   0xc   :  { %132 = vmatpush3.msra.mxu0 %v18_v8 }
   0xd   :  { %133 = vmatprep.subr.mxu0 %v148_v0 }
   0xe   :  { %134 = vmatpush3.msra.mxu0 %v17_v9 }
   0xf   :  { %135 = vmatprep.subr.mxu0 %v148_v0 }
  0x10   :  { %136 = vmatpush3.msra.mxu0 %v16_v10 }
  0x11   :  { %137 = vmatprep.subr.mxu0 %v148_v0 }
  0x12   :  { %138 = vmatpush3.msra.mxu0 %v15_v11 }
  0x13   :  { %140 = vmatmul.mubr.msk.f32.vlgmr.msra.gmra.mxu0 %vm30_vm1, %v14_v12 }
  0x7e   :  { %v28_v13 = vpop.permute.xlu0 %27 }
  0xd3   :  { %v100_v14 = vpop.f32.mrf.mxu0 }
  0xd4   :  { %v101_v15 = vadd.f32 %v100_v14, %v28_v13 }
  0xd5   :  { %v141_v16 = vpop.f32.mrf.mxu0 }
  0xd6   :  { %146 = vtanh.f32 %v101_v15 }
  0xe3   :  { %v147_v17 = vpop.eup %146 }
  0xe4   :  { %105 = vst [vmem:[%s210_s3] sm:$0xf] %v147_v17 }

</bundles_post_ra>
